<compile_context>
chip_gen: v6e
topology: v6e:2x2x1
jax: 0.10.0
libtpu: 0.0.40
codegen_flags: <defaults>
</compile_context>

<pallas_src>
import numpy as np
import jax
import jax.numpy as jnp
from jax.experimental import pallas as pl
from jax.experimental.pallas import tpu as pltpu


# ----------------------------------------------------------------------------
# Deterministic weight construction (same math as SoftErosion.__init__)
# ----------------------------------------------------------------------------
def _make_erosion_weights(kernel_size: int) -> np.ndarray:
    r = kernel_size // 2
    y_idx, x_idx = np.meshgrid(
        np.arange(kernel_size, dtype=np.float32),
        np.arange(kernel_size, dtype=np.float32),
        indexing="ij",
    )
    dist = np.sqrt((x_idx - r) ** 2 + (y_idx - r) ** 2)
    kern = dist.max() - dist
    kern = kern / kern.sum()
    return kern.astype(np.float32)


def _make_toeplitz_bank(w_np: np.ndarray, W: int) -> np.ndarray:
    """T[dy] is the (W, W) banded matrix s.t. (row-strip @ T[dy]) applies kernel
    row dy of the cross-correlation along width, with zero padding folded in."""
    K = w_np.shape[0]
    r = K // 2
    T = np.zeros((K, W, W), np.float32)
    cols = np.arange(W)
    for dy in range(K):
        for dx in range(K):
            j = cols + dx - r                     # source column for output col w
            valid = (j >= 0) & (j < W)
            T[dy, j[valid], cols[valid]] = w_np[dy, dx]
    return T


def _largest_divisor_leq(n: int, cap: int) -> int:
    cap = max(1, min(n, int(cap)))
    for d in range(cap, 0, -1):
        if n % d == 0:
            return d
    return 1


# ----------------------------------------------------------------------------
# Kernel 1: depthwise KxK convolution as K MXU Toeplitz matmuls
# ----------------------------------------------------------------------------
def _make_conv_kernel(B, H, W, K, fuse_min):
    r = K // 2
    Hp = H + 2 * r

    def conv_kernel(x_ref, t_ref, y_ref, xpad_ref):
        # Height-padded tile built in VMEM (no padded copy in HBM).
        xpad_ref[...] = jnp.zeros_like(xpad_ref)
        xpad_ref[:, r:r + H, :] = x_ref[...]

        # K matmuls on the MXU, accumulated in f32.
        acc = jnp.zeros((B * H, W), jnp.float32)
        for dy in range(K):
            strip = xpad_ref[:, dy:dy + H, :].reshape(B * H, W)
            acc = acc + jnp.dot(strip, t_ref[dy],
                                preferred_element_type=jnp.float32)

        y = acc.reshape(B, H, W)
        if fuse_min:                      # fused torch.min(x, conv(x))
            y = jnp.minimum(y, x_ref[...])
        y_ref[...] = y

    return conv_kernel


def _pick_conv_batch(NC, H, W, K):
    if H % 8 != 0:
        return 1                          # keep the (B, H) -> B*H collapse trivial
    r = K // 2
    Hp = H + 2 * r
    per_img = 4 * (Hp * W + 4 * H * W)    # scratch + double-buffered in/out blocks
    budget = 4 * 1024 * 1024
    return _largest_divisor_leq(NC, budget // max(per_img, 1))


def _build_conv(NC, H, W, K, fuse_min, B):
    r = K // 2
    Hp = H + 2 * r
    return pl.pallas_call(
        _make_conv_kernel(B, H, W, K, fuse_min),
        out_shape=jax.ShapeDtypeStruct((NC, H, W), jnp.float32),
        grid=(NC // B,),
        in_specs=[
            pl.BlockSpec((B, H, W), lambda i: (i, 0, 0)),
            pl.BlockSpec((K, W, W), lambda i: (0, 0, 0)),   # Toeplitz bank, resident
        ],
        out_specs=pl.BlockSpec((B, H, W), lambda i: (i, 0, 0)),
        scratch_shapes=[pltpu.VMEM((B, Hp, W), jnp.float32)],
        compiler_params=pltpu.CompilerParams(dimension_semantics=("parallel",)),
    )


# ----------------------------------------------------------------------------
# Kernel 2: single-pass threshold + normalize (scalar max delivered via SMEM)
# ----------------------------------------------------------------------------
def _make_normalize_kernel(threshold):
    thr = float(threshold)

    def norm_kernel(gmax_ref, y_ref, out_ref, mask_ref):
        y = y_ref[...]
        below = y < thr                                   # == ~mask
        out_ref[...] = jnp.where(below, y / gmax_ref[0], 1.0)
        mask_ref[...] = (~below).astype(jnp.int8)

    return norm_kernel


def _normalize_pallas(y, threshold):
    """y: (NC, H, W) conv output -> (out f32, mask int8), same shape."""
    NC, H, W = y.shape
    HW = H * W
    thr = float(threshold)

    # Global max of below-threshold values: tiny XLA reduction -> one scalar.
    gmax = jnp.max(jnp.where(y < thr, y, -jnp.inf)).astype(jnp.float32).reshape(1)

    kern = _make_normalize_kernel(thr)
    cparams = pltpu.CompilerParams(dimension_semantics=("parallel",))
    smem_spec = pl.BlockSpec(memory_space=pltpu.MemorySpace.SMEM)

    per_img = HW * (4 + 4 + 1) * 2        # y + out (f32) + mask (i8), double-buffered
    budget = 8 * 1024 * 1024

    if NC * per_img <= budget:
        # Lane-dense single block over the flattened images.
        y2 = y.reshape(NC, HW)
        out2, m2 = pl.pallas_call(
            kern,
            out_shape=(jax.ShapeDtypeStruct((NC, HW), jnp.float32),
                       jax.ShapeDtypeStruct((NC, HW), jnp.int8)),
            grid=(1,),
            in_specs=[smem_spec, pl.BlockSpec((NC, HW), lambda i: (0, 0))],
            out_specs=(pl.BlockSpec((NC, HW), lambda i: (0, 0)),
                       pl.BlockSpec((NC, HW), lambda i: (0, 0))),
            compiler_params=cparams,
        )(gmax, y2)
        return out2.reshape(NC, H, W), m2.reshape(NC, H, W)

    # Larger inputs: block over images, keep full (H, W) tiles.
    B = _largest_divisor_leq(NC, budget // max(per_img, 1))
    out3, m3 = pl.pallas_call(
        kern,
        out_shape=(jax.ShapeDtypeStruct((NC, H, W), jnp.float32),
                   jax.ShapeDtypeStruct((NC, H, W), jnp.int8)),
        grid=(NC // B,),
        in_specs=[smem_spec, pl.BlockSpec((B, H, W), lambda i: (i, 0, 0))],
        out_specs=(pl.BlockSpec((B, H, W), lambda i: (i, 0, 0)),
                   pl.BlockSpec((B, H, W), lambda i: (i, 0, 0))),
        compiler_params=cparams,
    )(gmax, y)
    return out3, m3


# ----------------------------------------------------------------------------
# Full SoftErosion forward
# ----------------------------------------------------------------------------
def soft_erosion(x, kernel_size=15, threshold=0.6, iterations=1):
    """x: (N, C, H, W). Returns (out f32 (N,C,H,W), mask bool (N,C,H,W))."""
    N, C, H, W = x.shape
    NC = N * C
    w_np = _make_erosion_weights(kernel_size)
    T = jnp.asarray(_make_toeplitz_bank(w_np, W))

    xf = x.astype(jnp.float32).reshape(NC, H, W)
    B = _pick_conv_batch(NC, H, W, kernel_size)
    # TODO(synk): very large masks (>= ~2048^2, esp. on v7x's 64 MiB VMEM) would
    # additionally need row-strip tiling with a K-1 halo inside the conv kernel.

    if iterations > 1:
        conv_min = _build_conv(NC, H, W, kernel_size, True, B)
        for _ in range(iterations - 1):
            xf = conv_min(xf, T)
    conv = _build_conv(NC, H, W, kernel_size, False, B)
    y = conv(xf, T)

    # NOTE: if no element falls below threshold, PyTorch's `x[~mask].max()`
    # raises on an empty tensor; here the output is simply all ones.
    out3, mask3 = _normalize_pallas(y, threshold)
    out = out3.reshape(N, C, H, W)
    mask = (mask3 != 0).reshape(N, C, H, W)
    return out, mask


if __name__ == "__main__":
    key = jax.random.PRNGKey(0)
    # SoftErosion is applied to single-channel soft masks -> C = 1.
    x = jax.random.uniform(key, (2, 1, 16, 16), dtype=jnp.float32)

    out, mask = soft_erosion(x, kernel_size=15, threshold=0.6, iterations=1)
    out = jax.block_until_ready(out)
    mask = jax.block_until_ready(mask)
    assert out.shape == (2, 1, 16, 16) and out.dtype == jnp.float32
    assert mask.shape == (2, 1, 16, 16) and mask.dtype == jnp.bool_

    # Exercise the fused-min (iterations > 1) path as well.
    out2, mask2 = soft_erosion(x, kernel_size=15, threshold=0.6, iterations=2)
    jax.block_until_ready(out2)
    jax.block_until_ready(mask2)

    print("KERNEL_OK")
</pallas_src>

<mosaic_0001>
module attributes {stable_mosaic.version = 11 : i64} {
  func.func @conv_kernel(%arg0: i32, %arg1: memref<2x16x16xf32, #tpu.memory_space<vmem>>, %arg2: memref<15x16x16xf32, #tpu.memory_space<vmem>>, %arg3: memref<2x16x16xf32, #tpu.memory_space<vmem>>, %arg4: memref<2x30x16xf32, #tpu.memory_space<vmem>>) attributes {dimension_semantics = [#tpu.dimension_semantics<parallel>], iteration_bounds = array<i64: 1>, scalar_prefetch = 0 : i64, scratch_operands = 1 : i64, tpu.core_type = #tpu.core_type<tc>, window_params = [{transform_indices = @transform_0, window_bounds = array<i64: 2, 16, 16>}, {pipeline_mode = #tpu.pipeline_mode<synchronous>, transform_indices = @transform_1, window_bounds = array<i64: 15, 16, 16>}, {transform_indices = @transform_2, window_bounds = array<i64: 2, 16, 16>}]} {
    %cst = arith.constant 0.000000e+00 : f32
    %0 = vector.broadcast %cst : f32 to vector<2x30x16xf32>
    %c0 = arith.constant 0 : index
    %c0_0 = arith.constant 0 : index
    %c0_1 = arith.constant 0 : index
    %1 = vector.load %arg4[%c0, %c0_0, %c0_1] : memref<2x30x16xf32, #tpu.memory_space<vmem>>, vector<2x30x16xf32>
    tpu.vector_store %arg4[%c0, %c0_0, %c0_1], %0 {strides = array<i32>} : memref<2x30x16xf32, #tpu.memory_space<vmem>>, vector<2x30x16xf32>,
    %c0_2 = arith.constant 0 : index
    %c0_3 = arith.constant 0 : index
    %c0_4 = arith.constant 0 : index
    %2 = vector.load %arg1[%c0_2, %c0_3, %c0_4] : memref<2x16x16xf32, #tpu.memory_space<vmem>>, vector<2x16x16xf32>
    %c0_5 = arith.constant 0 : index
    %c7 = arith.constant 7 : index
    %c0_6 = arith.constant 0 : index
    %3 = vector.load %arg4[%c0_5, %c7, %c0_6] : memref<2x30x16xf32, #tpu.memory_space<vmem>>, vector<2x16x16xf32>
    tpu.vector_store %arg4[%c0_5, %c7, %c0_6], %2 {strides = array<i32>} : memref<2x30x16xf32, #tpu.memory_space<vmem>>, vector<2x16x16xf32>,
    %cst_7 = arith.constant 0.000000e+00 : f32
    %4 = vector.broadcast %cst_7 : f32 to vector<32x16xf32>
    %c0_8 = arith.constant 0 : index
    %c0_9 = arith.constant 0 : index
    %c0_10 = arith.constant 0 : index
    %5 = vector.load %arg4[%c0_8, %c0_9, %c0_10] : memref<2x30x16xf32, #tpu.memory_space<vmem>>, vector<2x16x16xf32>
    %6 = vector.shape_cast %5 : vector<2x16x16xf32> to vector<32x16xf32>
    %c0_11 = arith.constant 0 : index
    %c0_12 = arith.constant 0 : index
    %c0_13 = arith.constant 0 : index
    %7 = vector.load %arg2[%c0_11, %c0_12, %c0_13] : memref<15x16x16xf32, #tpu.memory_space<vmem>>, vector<1x16x16xf32>
    %8 = vector.shape_cast %7 : vector<1x16x16xf32> to vector<16x16xf32>
    %cst_14 = arith.constant dense<0.000000e+00> : vector<32x16xf32>
    %9 = tpu.matmul %6, %8, %cst_14 {dimension_numbers = #tpu.dot_dimension_numbers<[1], [0], [0], [1], [0, 0, 1, 1], [], []>} : vector<32x16xf32>, vector<16x16xf32>, vector<32x16xf32> -> vector<32x16xf32>
    %10 = arith.addf %4, %9 : vector<32x16xf32>
    %c0_15 = arith.constant 0 : index
    %c1 = arith.constant 1 : index
    %c0_16 = arith.constant 0 : index
    %11 = vector.load %arg4[%c0_15, %c1, %c0_16] : memref<2x30x16xf32, #tpu.memory_space<vmem>>, vector<2x16x16xf32>
    %12 = vector.shape_cast %11 : vector<2x16x16xf32> to vector<32x16xf32>
    %c1_17 = arith.constant 1 : index
    %c0_18 = arith.constant 0 : index
    %c0_19 = arith.constant 0 : index
    %13 = vector.load %arg2[%c1_17, %c0_18, %c0_19] : memref<15x16x16xf32, #tpu.memory_space<vmem>>, vector<1x16x16xf32>
    %14 = vector.shape_cast %13 : vector<1x16x16xf32> to vector<16x16xf32>
    %cst_20 = arith.constant dense<0.000000e+00> : vector<32x16xf32>
    %15 = tpu.matmul %12, %14, %cst_20 {dimension_numbers = #tpu.dot_dimension_numbers<[1], [0], [0], [1], [0, 0, 1, 1], [], []>} : vector<32x16xf32>, vector<16x16xf32>, vector<32x16xf32> -> vector<32x16xf32>
    %16 = arith.addf %10, %15 : vector<32x16xf32>
    %c0_21 = arith.constant 0 : index
    %c2 = arith.constant 2 : index
    %c0_22 = arith.constant 0 : index
    %17 = vector.load %arg4[%c0_21, %c2, %c0_22] : memref<2x30x16xf32, #tpu.memory_space<vmem>>, vector<2x16x16xf32>
    %18 = vector.shape_cast %17 : vector<2x16x16xf32> to vector<32x16xf32>
    %c2_23 = arith.constant 2 : index
    %c0_24 = arith.constant 0 : index
    %c0_25 = arith.constant 0 : index
    %19 = vector.load %arg2[%c2_23, %c0_24, %c0_25] : memref<15x16x16xf32, #tpu.memory_space<vmem>>, vector<1x16x16xf32>
    %20 = vector.shape_cast %19 : vector<1x16x16xf32> to vector<16x16xf32>
    %cst_26 = arith.constant dense<0.000000e+00> : vector<32x16xf32>
    %21 = tpu.matmul %18, %20, %cst_26 {dimension_numbers = #tpu.dot_dimension_numbers<[1], [0], [0], [1], [0, 0, 1, 1], [], []>} : vector<32x16xf32>, vector<16x16xf32>, vector<32x16xf32> -> vector<32x16xf32>
    %22 = arith.addf %16, %21 : vector<32x16xf32>
    %c0_27 = arith.constant 0 : index
    %c3 = arith.constant 3 : index
    %c0_28 = arith.constant 0 : index
    %23 = vector.load %arg4[%c0_27, %c3, %c0_28] : memref<2x30x16xf32, #tpu.memory_space<vmem>>, vector<2x16x16xf32>
    %24 = vector.shape_cast %23 : vector<2x16x16xf32> to vector<32x16xf32>
    %c3_29 = arith.constant 3 : index
    %c0_30 = arith.constant 0 : index
    %c0_31 = arith.constant 0 : index
    %25 = vector.load %arg2[%c3_29, %c0_30, %c0_31] : memref<15x16x16xf32, #tpu.memory_space<vmem>>, vector<1x16x16xf32>
    %26 = vector.shape_cast %25 : vector<1x16x16xf32> to vector<16x16xf32>
    %cst_32 = arith.constant dense<0.000000e+00> : vector<32x16xf32>
    %27 = tpu.matmul %24, %26, %cst_32 {dimension_numbers = #tpu.dot_dimension_numbers<[1], [0], [0], [1], [0, 0, 1, 1], [], []>} : vector<32x16xf32>, vector<16x16xf32>, vector<32x16xf32> -> vector<32x16xf32>
    %28 = arith.addf %22, %27 : vector<32x16xf32>
    %c0_33 = arith.constant 0 : index
    %c4 = arith.constant 4 : index
    %c0_34 = arith.constant 0 : index
    %29 = vector.load %arg4[%c0_33, %c4, %c0_34] : memref<2x30x16xf32, #tpu.memory_space<vmem>>, vector<2x16x16xf32>
    %30 = vector.shape_cast %29 : vector<2x16x16xf32> to vector<32x16xf32>
    %c4_35 = arith.constant 4 : index
    %c0_36 = arith.constant 0 : index
    %c0_37 = arith.constant 0 : index
    %31 = vector.load %arg2[%c4_35, %c0_36, %c0_37] : memref<15x16x16xf32, #tpu.memory_space<vmem>>, vector<1x16x16xf32>
    %32 = vector.shape_cast %31 : vector<1x16x16xf32> to vector<16x16xf32>
    %cst_38 = arith.constant dense<0.000000e+00> : vector<32x16xf32>
    %33 = tpu.matmul %30, %32, %cst_38 {dimension_numbers = #tpu.dot_dimension_numbers<[1], [0], [0], [1], [0, 0, 1, 1], [], []>} : vector<32x16xf32>, vector<16x16xf32>, vector<32x16xf32> -> vector<32x16xf32>
    %34 = arith.addf %28, %33 : vector<32x16xf32>
    %c0_39 = arith.constant 0 : index
    %c5 = arith.constant 5 : index
    %c0_40 = arith.constant 0 : index
    %35 = vector.load %arg4[%c0_39, %c5, %c0_40] : memref<2x30x16xf32, #tpu.memory_space<vmem>>, vector<2x16x16xf32>
    %36 = vector.shape_cast %35 : vector<2x16x16xf32> to vector<32x16xf32>
    %c5_41 = arith.constant 5 : index
    %c0_42 = arith.constant 0 : index
    %c0_43 = arith.constant 0 : index
    %37 = vector.load %arg2[%c5_41, %c0_42, %c0_43] : memref<15x16x16xf32, #tpu.memory_space<vmem>>, vector<1x16x16xf32>
    %38 = vector.shape_cast %37 : vector<1x16x16xf32> to vector<16x16xf32>
    %cst_44 = arith.constant dense<0.000000e+00> : vector<32x16xf32>
    %39 = tpu.matmul %36, %38, %cst_44 {dimension_numbers = #tpu.dot_dimension_numbers<[1], [0], [0], [1], [0, 0, 1, 1], [], []>} : vector<32x16xf32>, vector<16x16xf32>, vector<32x16xf32> -> vector<32x16xf32>
    %40 = arith.addf %34, %39 : vector<32x16xf32>
    %c0_45 = arith.constant 0 : index
    %c6 = arith.constant 6 : index
    %c0_46 = arith.constant 0 : index
    %41 = vector.load %arg4[%c0_45, %c6, %c0_46] : memref<2x30x16xf32, #tpu.memory_space<vmem>>, vector<2x16x16xf32>
    %42 = vector.shape_cast %41 : vector<2x16x16xf32> to vector<32x16xf32>
    %c6_47 = arith.constant 6 : index
    %c0_48 = arith.constant 0 : index
    %c0_49 = arith.constant 0 : index
    %43 = vector.load %arg2[%c6_47, %c0_48, %c0_49] : memref<15x16x16xf32, #tpu.memory_space<vmem>>, vector<1x16x16xf32>
    %44 = vector.shape_cast %43 : vector<1x16x16xf32> to vector<16x16xf32>
    %cst_50 = arith.constant dense<0.000000e+00> : vector<32x16xf32>
    %45 = tpu.matmul %42, %44, %cst_50 {dimension_numbers = #tpu.dot_dimension_numbers<[1], [0], [0], [1], [0, 0, 1, 1], [], []>} : vector<32x16xf32>, vector<16x16xf32>, vector<32x16xf32> -> vector<32x16xf32>
    %46 = arith.addf %40, %45 : vector<32x16xf32>
    %c0_51 = arith.constant 0 : index
    %c7_52 = arith.constant 7 : index
    %c0_53 = arith.constant 0 : index
    %47 = vector.load %arg4[%c0_51, %c7_52, %c0_53] : memref<2x30x16xf32, #tpu.memory_space<vmem>>, vector<2x16x16xf32>
    %48 = vector.shape_cast %47 : vector<2x16x16xf32> to vector<32x16xf32>
    %c7_54 = arith.constant 7 : index
    %c0_55 = arith.constant 0 : index
    %c0_56 = arith.constant 0 : index
    %49 = vector.load %arg2[%c7_54, %c0_55, %c0_56] : memref<15x16x16xf32, #tpu.memory_space<vmem>>, vector<1x16x16xf32>
    %50 = vector.shape_cast %49 : vector<1x16x16xf32> to vector<16x16xf32>
    %cst_57 = arith.constant dense<0.000000e+00> : vector<32x16xf32>
    %51 = tpu.matmul %48, %50, %cst_57 {dimension_numbers = #tpu.dot_dimension_numbers<[1], [0], [0], [1], [0, 0, 1, 1], [], []>} : vector<32x16xf32>, vector<16x16xf32>, vector<32x16xf32> -> vector<32x16xf32>
    %52 = arith.addf %46, %51 : vector<32x16xf32>
    %c0_58 = arith.constant 0 : index
    %c8 = arith.constant 8 : index
    %c0_59 = arith.constant 0 : index
    %53 = vector.load %arg4[%c0_58, %c8, %c0_59] : memref<2x30x16xf32, #tpu.memory_space<vmem>>, vector<2x16x16xf32>
    %54 = vector.shape_cast %53 : vector<2x16x16xf32> to vector<32x16xf32>
    %c8_60 = arith.constant 8 : index
    %c0_61 = arith.constant 0 : index
    %c0_62 = arith.constant 0 : index
    %55 = vector.load %arg2[%c8_60, %c0_61, %c0_62] : memref<15x16x16xf32, #tpu.memory_space<vmem>>, vector<1x16x16xf32>
    %56 = vector.shape_cast %55 : vector<1x16x16xf32> to vector<16x16xf32>
    %cst_63 = arith.constant dense<0.000000e+00> : vector<32x16xf32>
    %57 = tpu.matmul %54, %56, %cst_63 {dimension_numbers = #tpu.dot_dimension_numbers<[1], [0], [0], [1], [0, 0, 1, 1], [], []>} : vector<32x16xf32>, vector<16x16xf32>, vector<32x16xf32> -> vector<32x16xf32>
    %58 = arith.addf %52, %57 : vector<32x16xf32>
    %c0_64 = arith.constant 0 : index
    %c9 = arith.constant 9 : index
    %c0_65 = arith.constant 0 : index
    %59 = vector.load %arg4[%c0_64, %c9, %c0_65] : memref<2x30x16xf32, #tpu.memory_space<vmem>>, vector<2x16x16xf32>
    %60 = vector.shape_cast %59 : vector<2x16x16xf32> to vector<32x16xf32>
    %c9_66 = arith.constant 9 : index
    %c0_67 = arith.constant 0 : index
    %c0_68 = arith.constant 0 : index
    %61 = vector.load %arg2[%c9_66, %c0_67, %c0_68] : memref<15x16x16xf32, #tpu.memory_space<vmem>>, vector<1x16x16xf32>
    %62 = vector.shape_cast %61 : vector<1x16x16xf32> to vector<16x16xf32>
    %cst_69 = arith.constant dense<0.000000e+00> : vector<32x16xf32>
    %63 = tpu.matmul %60, %62, %cst_69 {dimension_numbers = #tpu.dot_dimension_numbers<[1], [0], [0], [1], [0, 0, 1, 1], [], []>} : vector<32x16xf32>, vector<16x16xf32>, vector<32x16xf32> -> vector<32x16xf32>
    %64 = arith.addf %58, %63 : vector<32x16xf32>
    %c0_70 = arith.constant 0 : index
    %c10 = arith.constant 10 : index
    %c0_71 = arith.constant 0 : index
    %65 = vector.load %arg4[%c0_70, %c10, %c0_71] : memref<2x30x16xf32, #tpu.memory_space<vmem>>, vector<2x16x16xf32>
    %66 = vector.shape_cast %65 : vector<2x16x16xf32> to vector<32x16xf32>
    %c10_72 = arith.constant 10 : index
    %c0_73 = arith.constant 0 : index
    %c0_74 = arith.constant 0 : index
    %67 = vector.load %arg2[%c10_72, %c0_73, %c0_74] : memref<15x16x16xf32, #tpu.memory_space<vmem>>, vector<1x16x16xf32>
    %68 = vector.shape_cast %67 : vector<1x16x16xf32> to vector<16x16xf32>
    %cst_75 = arith.constant dense<0.000000e+00> : vector<32x16xf32>
    %69 = tpu.matmul %66, %68, %cst_75 {dimension_numbers = #tpu.dot_dimension_numbers<[1], [0], [0], [1], [0, 0, 1, 1], [], []>} : vector<32x16xf32>, vector<16x16xf32>, vector<32x16xf32> -> vector<32x16xf32>
    %70 = arith.addf %64, %69 : vector<32x16xf32>
    %c0_76 = arith.constant 0 : index
    %c11 = arith.constant 11 : index
    %c0_77 = arith.constant 0 : index
    %71 = vector.load %arg4[%c0_76, %c11, %c0_77] : memref<2x30x16xf32, #tpu.memory_space<vmem>>, vector<2x16x16xf32>
    %72 = vector.shape_cast %71 : vector<2x16x16xf32> to vector<32x16xf32>
    %c11_78 = arith.constant 11 : index
    %c0_79 = arith.constant 0 : index
    %c0_80 = arith.constant 0 : index
    %73 = vector.load %arg2[%c11_78, %c0_79, %c0_80] : memref<15x16x16xf32, #tpu.memory_space<vmem>>, vector<1x16x16xf32>
    %74 = vector.shape_cast %73 : vector<1x16x16xf32> to vector<16x16xf32>
    %cst_81 = arith.constant dense<0.000000e+00> : vector<32x16xf32>
    %75 = tpu.matmul %72, %74, %cst_81 {dimension_numbers = #tpu.dot_dimension_numbers<[1], [0], [0], [1], [0, 0, 1, 1], [], []>} : vector<32x16xf32>, vector<16x16xf32>, vector<32x16xf32> -> vector<32x16xf32>
    %76 = arith.addf %70, %75 : vector<32x16xf32>
    %c0_82 = arith.constant 0 : index
    %c12 = arith.constant 12 : index
    %c0_83 = arith.constant 0 : index
    %77 = vector.load %arg4[%c0_82, %c12, %c0_83] : memref<2x30x16xf32, #tpu.memory_space<vmem>>, vector<2x16x16xf32>
    %78 = vector.shape_cast %77 : vector<2x16x16xf32> to vector<32x16xf32>
    %c12_84 = arith.constant 12 : index
    %c0_85 = arith.constant 0 : index
    %c0_86 = arith.constant 0 : index
    %79 = vector.load %arg2[%c12_84, %c0_85, %c0_86] : memref<15x16x16xf32, #tpu.memory_space<vmem>>, vector<1x16x16xf32>
    %80 = vector.shape_cast %79 : vector<1x16x16xf32> to vector<16x16xf32>
    %cst_87 = arith.constant dense<0.000000e+00> : vector<32x16xf32>
    %81 = tpu.matmul %78, %80, %cst_87 {dimension_numbers = #tpu.dot_dimension_numbers<[1], [0], [0], [1], [0, 0, 1, 1], [], []>} : vector<32x16xf32>, vector<16x16xf32>, vector<32x16xf32> -> vector<32x16xf32>
    %82 = arith.addf %76, %81 : vector<32x16xf32>
    %c0_88 = arith.constant 0 : index
    %c13 = arith.constant 13 : index
    %c0_89 = arith.constant 0 : index
    %83 = vector.load %arg4[%c0_88, %c13, %c0_89] : memref<2x30x16xf32, #tpu.memory_space<vmem>>, vector<2x16x16xf32>
    %84 = vector.shape_cast %83 : vector<2x16x16xf32> to vector<32x16xf32>
    %c13_90 = arith.constant 13 : index
    %c0_91 = arith.constant 0 : index
    %c0_92 = arith.constant 0 : index
    %85 = vector.load %arg2[%c13_90, %c0_91, %c0_92] : memref<15x16x16xf32, #tpu.memory_space<vmem>>, vector<1x16x16xf32>
    %86 = vector.shape_cast %85 : vector<1x16x16xf32> to vector<16x16xf32>
    %cst_93 = arith.constant dense<0.000000e+00> : vector<32x16xf32>
    %87 = tpu.matmul %84, %86, %cst_93 {dimension_numbers = #tpu.dot_dimension_numbers<[1], [0], [0], [1], [0, 0, 1, 1], [], []>} : vector<32x16xf32>, vector<16x16xf32>, vector<32x16xf32> -> vector<32x16xf32>
    %88 = arith.addf %82, %87 : vector<32x16xf32>
    %c0_94 = arith.constant 0 : index
    %c14 = arith.constant 14 : index
    %c0_95 = arith.constant 0 : index
    %89 = vector.load %arg4[%c0_94, %c14, %c0_95] : memref<2x30x16xf32, #tpu.memory_space<vmem>>, vector<2x16x16xf32>
    %90 = vector.shape_cast %89 : vector<2x16x16xf32> to vector<32x16xf32>
    %c14_96 = arith.constant 14 : index
    %c0_97 = arith.constant 0 : index
    %c0_98 = arith.constant 0 : index
    %91 = vector.load %arg2[%c14_96, %c0_97, %c0_98] : memref<15x16x16xf32, #tpu.memory_space<vmem>>, vector<1x16x16xf32>
    %92 = vector.shape_cast %91 : vector<1x16x16xf32> to vector<16x16xf32>
    %cst_99 = arith.constant dense<0.000000e+00> : vector<32x16xf32>
    %93 = tpu.matmul %90, %92, %cst_99 {dimension_numbers = #tpu.dot_dimension_numbers<[1], [0], [0], [1], [0, 0, 1, 1], [], []>} : vector<32x16xf32>, vector<16x16xf32>, vector<32x16xf32> -> vector<32x16xf32>
    %94 = arith.addf %88, %93 : vector<32x16xf32>
    %95 = vector.shape_cast %94 : vector<32x16xf32> to vector<2x16x16xf32>
    %c0_100 = arith.constant 0 : index
    %c0_101 = arith.constant 0 : index
    %c0_102 = arith.constant 0 : index
    %96 = vector.load %arg3[%c0_100, %c0_101, %c0_102] : memref<2x16x16xf32, #tpu.memory_space<vmem>>, vector<2x16x16xf32>
    tpu.vector_store %arg3[%c0_100, %c0_101, %c0_102], %95 {strides = array<i32>} : memref<2x16x16xf32, #tpu.memory_space<vmem>>, vector<2x16x16xf32>,
    return
  }
  func.func @transform_0(%arg0: i32) -> (i32, i32, i32) {
    %c0_i32 = arith.constant 0 : i32
    %c0_i32_0 = arith.constant 0 : i32
    %c0_i32_1 = arith.constant 0 : i32
    return %arg0, %c0_i32, %c0_i32_0 : i32, i32, i32
  }
  func.func @transform_1(%arg0: i32) -> (i32, i32, i32) {
    %c0_i32 = arith.constant 0 : i32
    %c0_i32_0 = arith.constant 0 : i32
    %c0_i32_1 = arith.constant 0 : i32
    %c0_i32_2 = arith.constant 0 : i32
    return %c0_i32, %c0_i32_0, %c0_i32_1 : i32, i32, i32
  }
  func.func @transform_2(%arg0: i32) -> (i32, i32, i32) {
    %c0_i32 = arith.constant 0 : i32
    %c0_i32_0 = arith.constant 0 : i32
    %c0_i32_1 = arith.constant 0 : i32
    return %arg0, %c0_i32, %c0_i32_0 : i32, i32, i32
  }
}

</mosaic_0001>

<bundles_post_ra>
// kernel: tpu_custom_call.1
= control target key start
LH: loop header
LB: loop body
LE: loop exit
PB: predicated region body
PF: predicated region fallthrough
CT: control target
= control target key end

     0   :  { %7 = vsyncpa [#allocation4], 0  ;;  %s2236_s0 = inlined_call_operand.hbm [shape: f32[2,16,16], index: 0, kind: input, shape index: {}]   ;;  %s2237_s1 = inlined_call_operand.hbm [shape: f32[15,16,16], index: 1, kind: input, shape index: {}]   ;;  %s2238_s2 = inlined_call_operand.hbm [shape: f32[2,16,16], index: 2, kind: output, shape index: {}]  }
   0x1   :  { %8 = vsyncpa [#allocation7], 0 }
   0x2   :  { %9 = vsyncpa [#allocation5], 0  ;;  %s2067_s9 = smov [#allocation3]  }
   0x3   :  { %s15_s10 = sshll.u32 %s2067_s9, 4  ;;  %s16_s10 = int_to_ptr.vmem [resolvable:$true] %s15_s10 }
   0x4   :  { %s2009_s11 = scalar_lea.vmem %s16_s10, 512  ;;  %p2014_p1 = scmp.lt.s32.totalorder %s16_s10, %s16_s10 }
   0x5   :  { %p2010_p0 = scmp.ne.s32.totalorder %s16_s10, %s2009_s11  ;;  %p2015_p2 = scmp.lt.s32.totalorder %s2009_s11, %s2009_s11 }
   0x7   :  { %p2016_p3 = por %p2015_p2, %p2014_p1 }
   0x9   :  { %p2017_p4 = pnand %p2016_p3, %p2010_p0 }
   0xb   :  { %2020 = shalt.err (!%p2017_p4)
}
   0xc   :  { %s2068_s12 = smov 128   ;;  %s2069_s13 = smov 8  }
   0xd   :  { %21 = dma.hbm_to_vmem [thread:$0]  %s2236_s0, 512, %s16_s10, [#allocation4], %s2068_s12, %s2068_s12, %s2069_s13  }
   0xe   :  { %s2070_s16 = smov [#allocation6]  }
   0xf   :  { %s27_s17 = sshll.u32 %s2070_s16, 4  ;;  %s28_s17 = int_to_ptr.vmem [resolvable:$true] %s27_s17 }
  0x10   :  { %s2029_s18 = scalar_lea.vmem %s28_s17, 3840  ;;  %p2034_p6 = scmp.lt.s32.totalorder %s28_s17, %s28_s17 }
  0x11   :  { %p2030_p5 = scmp.ne.s32.totalorder %s28_s17, %s2029_s18  ;;  %p2035_p7 = scmp.lt.s32.totalorder %s2029_s18, %s2029_s18 }
  0x13   :  { %p2036_p8 = por %p2035_p7, %p2034_p6 }
  0x15   :  { %p2037_p9 = pnand %p2036_p8, %p2030_p5 }
  0x17   :  { %2040 = shalt.err (!%p2037_p9)
}
  0x18   :  { %33 = dma.hbm_to_vmem [thread:$0]  %s2237_s1, 3840, %s28_s17, [#allocation7], %s2068_s12, %s2068_s12, %s2069_s13  }
  0x19   :  { %2061 = dma.done.wait [#allocation4], 512  }
  0x1a   :  { %2062 = vsyncadd [#allocation4], 4294966784 }
  0x1b   :  { %2063 = dma.done.wait [#allocation7], 3840  }
  0x1c   :  { %2064 = vsyncadd [#allocation7], 4294963456  ;;  %vm40_vm0 = vcmask 130048   ;;  %vm44_vm1 = vcmask 128000   ;;  %v2071_v0 = vmov 0.0   ;;  %v70_v1 = vld [vmem:[#allocation6 + $0x18] sm:$0xff] }
  0x1d   :  { %41 = vst.msk [vmem:[#allocation2] sm:$0xff] %vm40_vm0, %v2071_v0  ;;  %42 = vst.msk [vmem:[#allocation2 + $0x8] sm:$0xff] %vm40_vm0, %v2071_v0  ;;  %v69_v2 = vld [vmem:[#allocation6 + $0x10] sm:$0xff]  ;;  %v50_v3 = vld [vmem:[#allocation3] sm:$0xff]  ;;  %1991 = vmatprep.subr.mxu1 %v70_v1  ;;  %1841 = vmatprep.subr.mxu0 %v70_v1  ;;  %s2072_s0 = smov [#allocation8]  }
  0x1e   :  { %43 = vst.msk [vmem:[#allocation2 + $0x10] sm:$0xff] %vm40_vm0, %v2071_v0  ;;  %46 = vst.msk [vmem:[#allocation2 + $0x20] sm:$0xff] %vm40_vm0, %v2071_v0  ;;  %v52_v4 = vld [vmem:[#allocation3 + $0x10] sm:$0xff]  ;;  %v51_v5 = vld [vmem:[#allocation3 + $0x8] sm:$0xff]  ;;  %1993 = vmatpush3.msra.mxu1 %v70_v1  ;;  %1842 = vmatpush3.msra.mxu0 %v70_v1  ;;  %s1678_s1 = sshll.u32 %s2072_s0, 4  ;;  %s1679_s1 = int_to_ptr.vmem [resolvable:$true] %s1678_s1 }
  0x1f   :  { %47 = vst.msk [vmem:[#allocation2 + $0x28] sm:$0xff] %vm40_vm0, %v2071_v0  ;;  %48 = vst.msk [vmem:[#allocation2 + $0x30] sm:$0xff] %vm40_vm0, %v2071_v0  ;;  %v63_v6 = vld [vmem:[#allocation6 + $0x8] sm:$0xff]  ;;  %v53_v7 = vld [vmem:[#allocation3 + $0x18] sm:$0xff]  ;;  %1992 = vmatprep.subr.mxu1 %v69_v2  ;;  %1843 = vmatprep.subr.mxu0 %v69_v2  ;;  %s2041_s21 = scalar_lea.vmem %s1679_s1, 512  ;;  %p2046_p11 = scmp.lt.s32.totalorder %s1679_s1, %s1679_s1 }
  0x20   :  { %45 = vst.msk [vmem:[#allocation2 + $0x18] sm:$0x3f] %vm44_vm1, %v2071_v0  ;;  %49 = vst.msk [vmem:[#allocation2 + $0x38] sm:$0x3f] %vm44_vm1, %v2071_v0  ;;  %v271_v8 = vld [vmem:[#allocation6 + $0x28] sm:$0xff]  ;;  %1994 = vmatpush3.msra.mxu1 %v69_v2  ;;  %1844 = vmatpush3.msra.mxu0 %v69_v2  ;;  %v270_v12 = vld [vmem:[#allocation6 + $0x20] sm:$0xff]  ;;  %p2042_p10 = scmp.ne.s32.totalorder %s1679_s1, %s2041_s21  ;;  %p2047_p12 = scmp.lt.s32.totalorder %s2041_s21, %s2041_s21 }
  0x21   :  { %54 = vst.msk [vmem:[#allocation2 + $0x7] sm:$0xff] %vm40_vm0, %v50_v3  ;;  %56 = vst.msk [vmem:[#allocation2 + $0x27] sm:$0xff] %vm40_vm0, %v52_v4  ;;  %1851 = vmatprep.subr.mxu1 %v63_v6  ;;  %1861 = vmatprep.subr.mxu0 %v271_v8  ;;  %v62_v14 = vld [vmem:[#allocation6] sm:$0xff]  ;;  %v379_v17 = vld [vmem:[#allocation6 + $0x38] sm:$0xff] }
  0x22   :  { %55 = vst.msk [vmem:[#allocation2 + $0xf] sm:$0xff] %vm40_vm0, %v51_v5  ;;  %57 = vst.msk [vmem:[#allocation2 + $0x2f] sm:$0xff] %vm40_vm0, %v53_v7  ;;  %v487_v20 = vld [vmem:[#allocation6 + $0x48] sm:$0xff]  ;;  %v378_v23 = vld [vmem:[#allocation6 + $0x30] sm:$0xff]  ;;  %p2048_p13 = por %p2047_p12, %p2046_p11 }
  0x23   :  { %v486_v26 = vld [vmem:[#allocation6 + $0x40] sm:$0xff]  ;;  %v595_v29 = vld [vmem:[#allocation6 + $0x58] sm:$0xff]  ;;  %v703_v32 = vld [vmem:[#allocation6 + $0x68] sm:$0xff] }
  0x24   :  { %v594_v35 = vld [vmem:[#allocation6 + $0x50] sm:$0xff]  ;;  %v702_v38 = vld [vmem:[#allocation6 + $0x60] sm:$0xff]  ;;  %v811_v41 = vld [vmem:[#allocation6 + $0x78] sm:$0xff]  ;;  %p2049_p0 = pnand %p2048_p13, %p2042_p10 }
  0x25   :  { %v919_v44 = vld [vmem:[#allocation6 + $0x88] sm:$0xff]  ;;  %v810_v47 = vld [vmem:[#allocation6 + $0x70] sm:$0xff]  ;;  %v918_v50 = vld [vmem:[#allocation6 + $0x80] sm:$0xff] }
  0x26   :  { %v1027_v52 = vld [vmem:[#allocation6 + $0x98] sm:$0xff]  ;;  %v1135_v55 = vld [vmem:[#allocation6 + $0xa8] sm:$0xff]  ;;  %v1026_v57 = vld [vmem:[#allocation6 + $0x90] sm:$0xff] }
  0x27   :  { %v1134_v60 = vld [vmem:[#allocation6 + $0xa0] sm:$0xff]  ;;  %v1243_v61 = vld [vmem:[#allocation6 + $0xb8] sm:$0xff]  ;;  %v1351_v0 = vld [vmem:[#allocation6 + $0xc8] sm:$0xff] }
  0x28   :  { %v64_v9 = vld [vmem:[#allocation2 + $0x1] sm:$0xff]  ;;  %v1242_v1 = vld [vmem:[#allocation6 + $0xb0] sm:$0xff]  ;;  %v1459_v5 = vld [vmem:[#allocation6 + $0xd8] sm:$0xff] }
  0x29   :  { %1845 = vmatprep.mubr.msk.f32.mxu0 %vm40_vm0, %v64_v9  ;;  %v66_v10 = vld [vmem:[#allocation2 + $0x21] sm:$0xff]  ;;  %v2111_v11 = vld [vmem:[#allocation2 + $0x9] sm:$0xff]  ;;  %v1022_v62 = vld [vmem:[#allocation2 + $0x11] sm:$0xff] }
  0x2a   :  { %1848 = vmatprep.mubr.msk.f32.mxu1 %vm40_vm0, %v66_v10  ;;  %1846 = vmatmul.mubr.msk.f32.vlgmr.msra.gmra.mxu0 %vm40_vm0, %v2111_v11  ;;  %v2116_v13 = vld [vmem:[#allocation2 + $0x29] sm:$0xff]  ;;  %v58_v15 = vld [vmem:[#allocation2] sm:$0xff]  ;;  %v1130_v63 = vld [vmem:[#allocation2 + $0x12] sm:$0xff] }
  0x2b   :  { %1849 = vmatmul.mubr.msk.f32.vlgmr.msra.gmra.mxu1 %vm40_vm0, %v2116_v13  ;;  %1862 = vmatpush3.msra.mxu0 %v271_v8  ;;  %v265_v16 = vld [vmem:[#allocation2 + $0x2] sm:$0xff]  ;;  %v2123_v19 = vld [vmem:[#allocation2 + $0xa] sm:$0xff]  ;;  %v1132_v3 = vld [vmem:[#allocation2 + $0x32] sm:$0xff] }
  0x2c   :  { %1852 = vmatpush3.msra.mxu1 %v63_v6  ;;  %1863 = vmatprep.subr.mxu0 %v270_v12  ;;  %v2121_v18 = vld [vmem:[#allocation2 + $0x8] sm:$0xff]  ;;  %v60_v21 = vld [vmem:[#allocation2 + $0x20] sm:$0xff]  ;;  %v914_v54 = vld [vmem:[#allocation2 + $0x10] sm:$0xff] }
  0x2d   :  { %1853 = vmatprep.subr.mxu1 %v62_v14  ;;  %1855 = vmatprep.mubr.msk.f32.mxu1 %vm40_vm0, %v58_v15  ;;  %v267_v22 = vld [vmem:[#allocation2 + $0x22] sm:$0xff]  ;;  %v2132_v25 = vld [vmem:[#allocation2 + $0x2a] sm:$0xff]  ;;  %v1238_v6 = vld [vmem:[#allocation2 + $0x13] sm:$0xff] }
  0x2e   :  { %1854 = vmatpush3.msra.mxu1 %v62_v14  ;;  %1864 = vmatpush3.msra.mxu0 %v270_v12  ;;  %v2130_v24 = vld [vmem:[#allocation2 + $0x28] sm:$0xff]  ;;  %v916_v59 = vld [vmem:[#allocation2 + $0x30] sm:$0xff]  ;;  %v1350_v4 = vld [vmem:[#allocation6 + $0xc0] sm:$0xff] }
  0x2f   :  { %1865 = vmatprep.mubr.msk.f32.mxu0 %vm40_vm0, %v265_v16  ;;  %1871 = vmatprep.subr.mxu1 %v379_v17  ;;  %v373_v27 = vld [vmem:[#allocation2 + $0x3] sm:$0xff]  ;;  %v2140_v30 = vld [vmem:[#allocation2 + $0xb] sm:$0xff]  ;;  %v1346_v7 = vld [vmem:[#allocation2 + $0x14] sm:$0xff] }
  0x30   :  { %1856 = vmatmul.mubr.msk.f32.vlgmr.msra.gmra.mxu1 %vm40_vm0, %v2121_v18  ;;  %1866 = vmatmul.mubr.msk.f32.vlgmr.msra.gmra.mxu0 %vm40_vm0, %v2123_v19  ;;  %v481_v28 = vld [vmem:[#allocation2 + $0x4] sm:$0xff]  ;;  %v2142_v31 = vld [vmem:[#allocation2 + $0xc] sm:$0xff]  ;;  %v1562_v14 = vld [vmem:[#allocation2 + $0x16] sm:$0xff] }
  0x31   :  { %1872 = vmatpush3.msra.mxu1 %v379_v17  ;;  %1881 = vmatprep.subr.mxu0 %v487_v20  ;;  %v375_v33 = vld [vmem:[#allocation2 + $0x23] sm:$0xff]  ;;  %v2150_v36 = vld [vmem:[#allocation2 + $0x2b] sm:$0xff]  ;;  %v1240_v10 = vld [vmem:[#allocation2 + $0x33] sm:$0xff] }
  0x32   :  { %1882 = vmatpush3.msra.mxu0 %v487_v20  ;;  %1858 = vmatprep.mubr.msk.f32.mxu1 %vm40_vm0, %v60_v21  ;;  %v483_v34 = vld [vmem:[#allocation2 + $0x24] sm:$0xff]  ;;  %v2152_v37 = vld [vmem:[#allocation2 + $0x2c] sm:$0xff]  ;;  %v1456_v15 = vld [vmem:[#allocation2 + $0x35] sm:$0xff] }
  0x33   :  { %1868 = vmatprep.mubr.msk.f32.mxu0 %vm40_vm0, %v267_v22  ;;  %1873 = vmatprep.subr.mxu1 %v378_v23  ;;  %v589_v39 = vld [vmem:[#allocation2 + $0x5] sm:$0xff]  ;;  %v2160_v42 = vld [vmem:[#allocation2 + $0xd] sm:$0xff]  ;;  %v1564_v16 = vld [vmem:[#allocation2 + $0x36] sm:$0xff] }
  0x34   :  { %1859 = vmatmul.mubr.msk.f32.gmra.mxu1 %vm40_vm0, %v2130_v24  ;;  %1869 = vmatmul.mubr.msk.f32.gmra.mxu0 %vm40_vm0, %v2132_v25  ;;  %v697_v40 = vld [vmem:[#allocation2 + $0x6] sm:$0xff]  ;;  %v2162_v43 = vld [vmem:[#allocation2 + $0xe] sm:$0xff] }
  0x35   :  { %1874 = vmatpush3.msra.mxu1 %v378_v23  ;;  %1883 = vmatprep.subr.mxu0 %v486_v26  ;;  %v591_v45 = vld [vmem:[#allocation2 + $0x25] sm:$0xff]  ;;  %v2170_v48 = vld [vmem:[#allocation2 + $0x2d] sm:$0xff] }
  0x36   :  { %1884 = vmatpush3.msra.mxu0 %v486_v26  ;;  %1875 = vmatprep.mubr.msk.f32.mxu1 %vm40_vm0, %v373_v27  ;;  %v699_v46 = vld [vmem:[#allocation2 + $0x26] sm:$0xff]  ;;  %v2172_v49 = vld [vmem:[#allocation2 + $0x2e] sm:$0xff] }
  0x37   :  { %1885 = vmatprep.mubr.msk.f32.mxu0 %vm40_vm0, %v481_v28  ;;  %1891 = vmatprep.subr.mxu1 %v595_v29  ;;  %v805_v51 = vld [vmem:[#allocation2 + $0x7] sm:$0xff]  ;;  %v806_v53 = vld [vmem:[#allocation2 + $0xf] sm:$0xff] }
  0x38   :  { %1876 = vmatmul.mubr.msk.f32.vlgmr.msra.gmra.mxu1 %vm40_vm0, %v2140_v30  ;;  %1886 = vmatmul.mubr.msk.f32.vlgmr.msra.gmra.mxu0 %vm40_vm0, %v2142_v31  ;;  %v807_v56 = vld [vmem:[#allocation2 + $0x27] sm:$0xff]  ;;  %v808_v58 = vld [vmem:[#allocation2 + $0x2f] sm:$0xff] }
  0x39   :  { %1892 = vmatpush3.msra.mxu1 %v595_v29  ;;  %1901 = vmatprep.subr.mxu0 %v703_v32  ;;  %v1024_v2 = vld [vmem:[#allocation2 + $0x31] sm:$0xff]  ;;  %v1567_v8 = vld [vmem:[#allocation6 + $0xe8] sm:$0xff]  ;;  %v1566_v12 = vld [vmem:[#allocation6 + $0xe0] sm:$0xff] }
  0x3a   :  { %1902 = vmatpush3.msra.mxu0 %v703_v32  ;;  %1878 = vmatprep.mubr.msk.f32.mxu1 %vm40_vm0, %v375_v33  ;;  %v1458_v9 = vld [vmem:[#allocation6 + $0xd0] sm:$0xff] }
  0x3b   :  { %1888 = vmatprep.mubr.msk.f32.mxu0 %vm40_vm0, %v483_v34  ;;  %1893 = vmatprep.subr.mxu1 %v594_v35 }
  0x3c   :  { %1879 = vmatmul.mubr.msk.f32.gmra.mxu1 %vm40_vm0, %v2150_v36  ;;  %1889 = vmatmul.mubr.msk.f32.gmra.mxu0 %vm40_vm0, %v2152_v37 }
  0x3d   :  { %1894 = vmatpush3.msra.mxu1 %v594_v35  ;;  %1903 = vmatprep.subr.mxu0 %v702_v38 }
  0x3e   :  { %1904 = vmatpush3.msra.mxu0 %v702_v38  ;;  %1895 = vmatprep.mubr.msk.f32.mxu1 %vm40_vm0, %v589_v39 }
  0x3f   :  { %1905 = vmatprep.mubr.msk.f32.mxu0 %vm40_vm0, %v697_v40  ;;  %1911 = vmatprep.subr.mxu1 %v811_v41 }
  0x40   :  { %1896 = vmatmul.mubr.msk.f32.vlgmr.msra.gmra.mxu1 %vm40_vm0, %v2160_v42  ;;  %1906 = vmatmul.mubr.msk.f32.vlgmr.msra.gmra.mxu0 %vm40_vm0, %v2162_v43 }
  0x41   :  { %1912 = vmatpush3.msra.mxu1 %v811_v41  ;;  %1921 = vmatprep.subr.mxu0 %v919_v44 }
  0x42   :  { %1922 = vmatpush3.msra.mxu0 %v919_v44  ;;  %1898 = vmatprep.mubr.msk.f32.mxu1 %vm40_vm0, %v591_v45 }
  0x43   :  { %1908 = vmatprep.mubr.msk.f32.mxu0 %vm40_vm0, %v699_v46  ;;  %1913 = vmatprep.subr.mxu1 %v810_v47 }
  0x44   :  { %1899 = vmatmul.mubr.msk.f32.gmra.mxu1 %vm40_vm0, %v2170_v48  ;;  %1909 = vmatmul.mubr.msk.f32.gmra.mxu0 %vm40_vm0, %v2172_v49 }
  0x45   :  { %1914 = vmatpush3.msra.mxu1 %v810_v47  ;;  %1923 = vmatprep.subr.mxu0 %v918_v50 }
  0x46   :  { %1924 = vmatpush3.msra.mxu0 %v918_v50  ;;  %1915 = vmatprep.mubr.msk.f32.mxu1 %vm40_vm0, %v805_v51 }
  0x47   :  { %1925 = vmatprep.mubr.msk.f32.mxu0 %vm40_vm0, %v2121_v18  ;;  %1931 = vmatprep.subr.mxu1 %v1027_v52 }
  0x48   :  { %1916 = vmatmul.mubr.msk.f32.vlgmr.msra.gmra.mxu1 %vm40_vm0, %v806_v53  ;;  %1926 = vmatmul.mubr.msk.f32.vlgmr.msra.gmra.mxu0 %vm40_vm0, %v914_v54 }
  0x49   :  { %1932 = vmatpush3.msra.mxu1 %v1027_v52  ;;  %1941 = vmatprep.subr.mxu0 %v1135_v55 }
  0x4a   :  { %1942 = vmatpush3.msra.mxu0 %v1135_v55  ;;  %1918 = vmatprep.mubr.msk.f32.mxu1 %vm40_vm0, %v807_v56 }
  0x4b   :  { %1928 = vmatprep.mubr.msk.f32.mxu0 %vm40_vm0, %v2130_v24  ;;  %1933 = vmatprep.subr.mxu1 %v1026_v57 }
  0x4c   :  { %1919 = vmatmul.mubr.msk.f32.gmra.mxu1 %vm40_vm0, %v808_v58  ;;  %1929 = vmatmul.mubr.msk.f32.gmra.mxu0 %vm40_vm0, %v916_v59 }
  0x4d   :  { %1934 = vmatpush3.msra.mxu1 %v1026_v57  ;;  %1943 = vmatprep.subr.mxu0 %v1134_v60 }
  0x4e   :  { %1944 = vmatpush3.msra.mxu0 %v1134_v60  ;;  %1935 = vmatprep.mubr.msk.f32.mxu1 %vm40_vm0, %v2111_v11  ;;  %v1348_v11 = vld [vmem:[#allocation2 + $0x34] sm:$0xff] }
  0x4f   :  { %1945 = vmatprep.mubr.msk.f32.mxu0 %vm40_vm0, %v2123_v19  ;;  %1951 = vmatprep.subr.mxu1 %v1243_v61 }
  0x50   :  { %1936 = vmatmul.mubr.msk.f32.vlgmr.msra.gmra.mxu1 %vm40_vm0, %v1022_v62  ;;  %1946 = vmatmul.mubr.msk.f32.vlgmr.msra.gmra.mxu0 %vm40_vm0, %v1130_v63 }
  0x51   :  { %1952 = vmatpush3.msra.mxu1 %v1243_v61  ;;  %1961 = vmatprep.subr.mxu0 %v1351_v0 }
  0x52   :  { %1962 = vmatpush3.msra.mxu0 %v1351_v0  ;;  %1938 = vmatprep.mubr.msk.f32.mxu1 %vm40_vm0, %v2116_v13  ;;  %v1454_v13 = vld [vmem:[#allocation2 + $0x15] sm:$0xff] }
  0x53   :  { %1948 = vmatprep.mubr.msk.f32.mxu0 %vm40_vm0, %v2132_v25  ;;  %1953 = vmatprep.subr.mxu1 %v1242_v1 }
  0x54   :  { %1939 = vmatmul.mubr.msk.f32.gmra.mxu1 %vm40_vm0, %v1024_v2  ;;  %1949 = vmatmul.mubr.msk.f32.gmra.mxu0 %vm40_vm0, %v1132_v3 }
  0x55   :  { %1954 = vmatpush3.msra.mxu1 %v1242_v1  ;;  %1963 = vmatprep.subr.mxu0 %v1350_v4 }
  0x56   :  { %1964 = vmatpush3.msra.mxu0 %v1350_v4  ;;  %1955 = vmatprep.mubr.msk.f32.mxu1 %vm40_vm0, %v2140_v30 }
  0x57   :  { %1965 = vmatprep.mubr.msk.f32.mxu0 %vm40_vm0, %v2142_v31  ;;  %1971 = vmatprep.subr.mxu1 %v1459_v5 }
  0x58   :  { %1956 = vmatmul.mubr.msk.f32.vlgmr.msra.gmra.mxu1 %vm40_vm0, %v1238_v6  ;;  %1966 = vmatmul.mubr.msk.f32.vlgmr.msra.gmra.mxu0 %vm40_vm0, %v1346_v7 }
  0x59   :  { %1972 = vmatpush3.msra.mxu1 %v1459_v5  ;;  %1981 = vmatprep.subr.mxu0 %v1567_v8 }
  0x5a   :  { %1982 = vmatpush3.msra.mxu0 %v1567_v8  ;;  %1958 = vmatprep.mubr.msk.f32.mxu1 %vm40_vm0, %v2150_v36 }
  0x5b   :  { %1968 = vmatprep.mubr.msk.f32.mxu0 %vm40_vm0, %v2152_v37  ;;  %1973 = vmatprep.subr.mxu1 %v1458_v9 }
  0x5c   :  { %1959 = vmatmul.mubr.msk.f32.gmra.mxu1 %vm40_vm0, %v1240_v10  ;;  %1969 = vmatmul.mubr.msk.f32.gmra.mxu0 %vm40_vm0, %v1348_v11 }
  0x5d   :  { %1974 = vmatpush3.msra.mxu1 %v1458_v9  ;;  %1983 = vmatprep.subr.mxu0 %v1566_v12 }
  0x5e   :  { %1984 = vmatpush3.msra.mxu0 %v1566_v12  ;;  %1975 = vmatprep.mubr.msk.f32.mxu1 %vm40_vm0, %v2160_v42 }
  0x5f   :  { %1985 = vmatprep.mubr.msk.f32.mxu0 %vm40_vm0, %v2162_v43 }
  0x60   :  { %1976 = vmatmul.mubr.msk.f32.vlgmr.msra.gmra.mxu1 %vm40_vm0, %v1454_v13  ;;  %1986 = vmatmul.mubr.msk.f32.vlgmr.msra.gmra.mxu0 %vm40_vm0, %v1562_v14 }
  0x61   :  { %1978 = vmatprep.mubr.msk.f32.mxu1 %vm40_vm0, %v2170_v48  ;;  %1988 = vmatprep.mubr.msk.f32.mxu0 %vm40_vm0, %v2172_v49 }
  0x64   :  { %1979 = vmatmul.mubr.msk.f32.gmra.mxu1 %vm40_vm0, %v1456_v15  ;;  %1989 = vmatmul.mubr.msk.f32.gmra.mxu0 %vm40_vm0, %v1564_v16 }
  0xea   :  { %v1847_v17 = vpop.f32.mrf.mxu0 }
  0xeb   :  { %v1850_v18 = vpop.f32.mrf.mxu1 }
  0xec   :  { %v149_v19 = vpop.f32.mrf.mxu0 }
  0xed   :  { %v159_v20 = vpop.f32.mrf.mxu1 }
  0xf0   :  { %v1857_v21 = vpop.f32.mrf.mxu1  ;;  %v1867_v22 = vpop.f32.mrf.mxu0 }
  0xf1   :  { %v252_v35 = vadd.f32 %v1857_v21, %v1847_v17 }
  0xf2   :  { %v246_v23 = vpop.f32.mrf.mxu1  ;;  %v350_v24 = vpop.f32.mrf.mxu0 }
  0xf3   :  { %v247_v38 = vadd.f32 %v246_v23, %v149_v19  ;;  %v370_v41 = vadd.f32 %v1867_v22, %v252_v35 }
  0xf4   :  { %v1860_v25 = vpop.f32.mrf.mxu1  ;;  %v1870_v26 = vpop.f32.mrf.mxu0 }
  0xf5   :  { %v262_v42 = vadd.f32 %v1860_v25, %v1850_v18  ;;  %v369_v45 = vadd.f32 %v350_v24, %v247_v38 }
  0xf6   :  { %v256_v27 = vpop.f32.mrf.mxu1  ;;  %v360_v28 = vpop.f32.mrf.mxu0 }
  0xf7   :  { %v257_v46 = vadd.f32 %v256_v27, %v159_v20  ;;  %v372_v50 = vadd.f32 %v1870_v26, %v262_v42 }
  0xf8   :  { %v1877_v29 = vpop.f32.mrf.mxu1  ;;  %v1887_v30 = vpop.f32.mrf.mxu0 }
  0xf9   :  { %v478_v47 = vadd.f32 %v1877_v29, %v370_v41  ;;  %v371_v54 = vadd.f32 %v360_v28, %v257_v46 }
  0xfa   :  { %v458_v31 = vpop.f32.mrf.mxu1  ;;  %v566_v32 = vpop.f32.mrf.mxu0 }
  0xfb   :  { %v477_v51 = vadd.f32 %v458_v31, %v369_v45  ;;  %v586_v55 = vadd.f32 %v1887_v30, %v478_v47 }
  0xfc   :  { %v1880_v33 = vpop.f32.mrf.mxu1  ;;  %v1890_v34 = vpop.f32.mrf.mxu0 }
  0xfd   :  { %v480_v56 = vadd.f32 %v1880_v33, %v372_v50  ;;  %v585_v59 = vadd.f32 %v566_v32, %v477_v51 }
  0xfe   :  { %v468_v36 = vpop.f32.mrf.mxu1  ;;  %v576_v37 = vpop.f32.mrf.mxu0 }
  0xff   :  { %v479_v60 = vadd.f32 %v468_v36, %v371_v54  ;;  %v588_v0 = vadd.f32 %v1890_v34, %v480_v56 }
 0x100   :  { %v1897_v39 = vpop.f32.mrf.mxu1  ;;  %v1907_v40 = vpop.f32.mrf.mxu0 }
 0x101   :  { %v694_v61 = vadd.f32 %v1897_v39, %v586_v55  ;;  %v587_v4 = vadd.f32 %v576_v37, %v479_v60 }
 0x102   :  { %v674_v43 = vpop.f32.mrf.mxu1  ;;  %v782_v44 = vpop.f32.mrf.mxu0 }
 0x103   :  { %v693_v1 = vadd.f32 %v674_v43, %v585_v59  ;;  %v802_v5 = vadd.f32 %v1907_v40, %v694_v61 }
 0x104   :  { %v1900_v48 = vpop.f32.mrf.mxu1  ;;  %v1910_v49 = vpop.f32.mrf.mxu0 }
 0x105   :  { %v696_v6 = vadd.f32 %v1900_v48, %v588_v0  ;;  %v801_v9 = vadd.f32 %v782_v44, %v693_v1 }
 0x106   :  { %v684_v52 = vpop.f32.mrf.mxu1  ;;  %v792_v53 = vpop.f32.mrf.mxu0 }
 0x107   :  { %v695_v10 = vadd.f32 %v684_v52, %v587_v4  ;;  %v804_v14 = vadd.f32 %v1910_v49, %v696_v6 }
 0x108   :  { %v1917_v57 = vpop.f32.mrf.mxu1  ;;  %v1927_v58 = vpop.f32.mrf.mxu0 }
 0x109   :  { %v910_v11 = vadd.f32 %v1917_v57, %v802_v5  ;;  %v803_v18 = vadd.f32 %v792_v53, %v695_v10 }
 0x10a   :  { %v890_v62 = vpop.f32.mrf.mxu1  ;;  %v998_v63 = vpop.f32.mrf.mxu0 }
 0x10b   :  { %v909_v15 = vadd.f32 %v890_v62, %v801_v9  ;;  %v1018_v19 = vadd.f32 %v1927_v58, %v910_v11 }
 0x10c   :  { %v1920_v2 = vpop.f32.mrf.mxu1  ;;  %v1930_v3 = vpop.f32.mrf.mxu0 }
 0x10d   :  { %v912_v20 = vadd.f32 %v1920_v2, %v804_v14  ;;  %v1017_v23 = vadd.f32 %v998_v63, %v909_v15 }
 0x10e   :  { %v900_v7 = vpop.f32.mrf.mxu1  ;;  %v1008_v8 = vpop.f32.mrf.mxu0 }
 0x10f   :  { %v911_v24 = vadd.f32 %v900_v7, %v803_v18  ;;  %v1020_v28 = vadd.f32 %v1930_v3, %v912_v20 }
 0x110   :  { %v1937_v12 = vpop.f32.mrf.mxu1  ;;  %v1947_v13 = vpop.f32.mrf.mxu0 }
 0x111   :  { %v1126_v25 = vadd.f32 %v1937_v12, %v1018_v19  ;;  %v1019_v32 = vadd.f32 %v1008_v8, %v911_v24 }
 0x112   :  { %v1106_v16 = vpop.f32.mrf.mxu1  ;;  %v1214_v17 = vpop.f32.mrf.mxu0 }
 0x113   :  { %v1125_v29 = vadd.f32 %v1106_v16, %v1017_v23  ;;  %v1234_v33 = vadd.f32 %v1947_v13, %v1126_v25 }
 0x114   :  { %v1940_v21 = vpop.f32.mrf.mxu1  ;;  %v1950_v22 = vpop.f32.mrf.mxu0 }
 0x115   :  { %v1128_v34 = vadd.f32 %v1940_v21, %v1020_v28  ;;  %v1233_v37 = vadd.f32 %v1214_v17, %v1125_v29 }
 0x116   :  { %v1116_v26 = vpop.f32.mrf.mxu1  ;;  %v1224_v27 = vpop.f32.mrf.mxu0 }
 0x117   :  { %v1127_v38 = vadd.f32 %v1116_v26, %v1019_v32  ;;  %v1236_v42 = vadd.f32 %v1950_v22, %v1128_v34 }
 0x118   :  { %v1957_v30 = vpop.f32.mrf.mxu1  ;;  %v1967_v31 = vpop.f32.mrf.mxu0 }
 0x119   :  { %v1342_v39 = vadd.f32 %v1957_v30, %v1234_v33  ;;  %v1235_v46 = vadd.f32 %v1224_v27, %v1127_v38 }
 0x11a   :  { %v1322_v35 = vpop.f32.mrf.mxu1  ;;  %v1430_v36 = vpop.f32.mrf.mxu0 }
 0x11b   :  { %v1341_v43 = vadd.f32 %v1322_v35, %v1233_v37  ;;  %v1450_v47 = vadd.f32 %v1967_v31, %v1342_v39 }
 0x11c   :  { %v1960_v40 = vpop.f32.mrf.mxu1  ;;  %v1970_v41 = vpop.f32.mrf.mxu0 }
 0x11d   :  { %v1344_v48 = vadd.f32 %v1960_v40, %v1236_v42  ;;  %v1449_v51 = vadd.f32 %v1430_v36, %v1341_v43 }
 0x11e   :  { %v1332_v44 = vpop.f32.mrf.mxu1  ;;  %v1440_v45 = vpop.f32.mrf.mxu0 }
 0x11f   :  { %v1343_v52 = vadd.f32 %v1332_v44, %v1235_v46  ;;  %v1452_v56 = vadd.f32 %v1970_v41, %v1344_v48 }
 0x120   :  { %v1977_v49 = vpop.f32.mrf.mxu1  ;;  %v1987_v50 = vpop.f32.mrf.mxu0 }
 0x121   :  { %v1558_v53 = vadd.f32 %v1977_v49, %v1450_v47  ;;  %v1451_v61 = vadd.f32 %v1440_v45, %v1343_v52 }
 0x122   :  { %v1538_v54 = vpop.f32.mrf.mxu1  ;;  %v1646_v55 = vpop.f32.mrf.mxu0 }
 0x123   :  { %v1666_v57 = vadd.f32 %v1987_v50, %v1558_v53  ;;  %v1557_v58 = vadd.f32 %v1538_v54, %v1449_v51 }
 0x124   :  { %v1980_v59 = vpop.f32.mrf.mxu1  ;;  %v1990_v60 = vpop.f32.mrf.mxu0 }
 0x125   :  { %1670 = vst.msk [vmem:[#allocation8 + $0x8] sm:$0xff] %vm40_vm0, %v1666_v57  ;;  %v1665_v62 = vadd.f32 %v1646_v55, %v1557_v58  ;;  %v1560_v63 = vadd.f32 %v1980_v59, %v1452_v56 }
 0x126   :  { %v1548_v0 = vpop.f32.mrf.mxu1  ;;  %v1656_v3 = vpop.f32.mrf.mxu0 }
 0x127   :  { %1669 = vst.msk [vmem:[#allocation8] sm:$0xff] %vm40_vm0, %v1665_v62  ;;  %v1668_v1 = vadd.f32 %v1990_v60, %v1560_v63  ;;  %v1559_v2 = vadd.f32 %v1548_v0, %v1451_v61 }
 0x129   :  { %1672 = vst.msk [vmem:[#allocation8 + $0x18] sm:$0xff] %vm40_vm0, %v1668_v1  ;;  %v1667_v4 = vadd.f32 %v1656_v3, %v1559_v2 }
 0x12b   :  { %1671 = vst.msk [vmem:[#allocation8 + $0x10] sm:$0xff] %vm40_vm0, %v1667_v4 }
 0x12c   :  { %2052 = shalt.err (!%p2049_p0)
}
 0x12d   :  { %1684 = dma.vmem_to_hbm [thread:$0]  %s1679_s1, 512, %s2238_s2, [#allocation5], %s2068_s12, %s2068_s12, %s2069_s13  }
 0x12e   :  { %2065 = dma.done.wait [#allocation5], 512  }
 0x12f   :  { %2066 = vsyncadd [#allocation5], 4294966784 }
 0x130   :  { %1688 = vsyncpa [#allocation4], 1 }
 0x131   :  { %1689 = vsyncpa [#allocation7], 1 }
 0x132   :  { %1690 = vsyncpa [#allocation5], 1 }

</bundles_post_ra>
